<compile_context>
chip_gen: v7x
topology: tpu7x:2x2x1
jax: 0.10.0
libtpu: 0.0.40
codegen_flags: <defaults>
</compile_context>

<pallas_src>
import functools

import jax
import jax.numpy as jnp
from jax.experimental import pallas as pl
from jax.experimental.pallas import tpu as pltpu

EPS = 1e-5


# ----------------------------------------------------------------------------
# In-kernel helpers
# ----------------------------------------------------------------------------
def _im2col_taps(x, tap_masks, row_w):
    """Build the (9*C, P) im2col slab of a flat-spatial tensor.

    x:         (C, P) f32, P = H*W flattened row-major spatial.
    tap_masks: (9, P) f32 0/1 validity mask per 3x3 tap (encodes zero padding).
    row_w:     W (row width of the flat grid), python int.
    """
    p = x.shape[-1]
    cols = []
    for ky in range(3):
        for kx in range(3):
            off = (ky - 1) * row_w + (kx - 1)
            if off == 0:
                cols.append(x)                    # centre tap: always valid
                continue
            shift = (-off) % p
            xs = pltpu.roll(x, shift=shift, axis=1)        # XLU lane rotate
            t = ky * 3 + kx
            cols.append(xs * tap_masks[t:t + 1, :])        # zero wrapped border
    return jnp.concatenate(cols, axis=0)                   # (9*C, P)


def _inconv_kernel(x_ref, w1_ref, b1_ref, wh_ref, bh_ref, wl_ref, bl_ref,
                   pool_ref, mh_ref, ml_ref, oh_ref, ol_ref, *, W, Wl):
    x = x_ref[0]                       # (Cin, H*W)
    mh = mh_ref[...]                   # (9, H*W)
    ml = ml_ref[...]                   # (9, Hl*Wl)

    # ---- stage 1: conv3x3 + folded BN(+bias) + ReLU  (h stays on-chip) -----
    xcol = _im2col_taps(x, mh, W)                                # (9*Cin, HW)
    h = jnp.dot(w1_ref[...], xcol, preferred_element_type=jnp.float32)
    h = jnp.maximum(h + b1_ref[...], 0.0)                        # (planes, HW)

    # ---- stage 2a: h2h conv + BN_h + ReLU  (lane-dense store) --------------
    hcol = _im2col_taps(h, mh, W)                                # (9*planes, HW)
    yh = jnp.dot(wh_ref[...], hcol, preferred_element_type=jnp.float32)
    oh_ref[0] = jnp.maximum(yh + bh_ref[...], 0.0).astype(oh_ref.dtype)

    # ---- stage 2b: 2x2 avg-pool (matmul) + h2l conv + BN_l + ReLU ----------
    hp = jnp.dot(h, pool_ref[...], preferred_element_type=jnp.float32)  # (planes, HWl)
    lcol = _im2col_taps(hp, ml, Wl)                              # (9*planes, HWl)
    yl = jnp.dot(wl_ref[...], lcol, preferred_element_type=jnp.float32)
    ol_ref[0] = jnp.maximum(yl + bl_ref[...], 0.0).astype(ol_ref.dtype)


# ----------------------------------------------------------------------------
# Wrapper-side constant construction (tiny, computed once per call)
# ----------------------------------------------------------------------------
def _fold_conv_bn(w_hwio, gamma, beta, mean, var, bias=None, eps=EPS):
    """Fold inference BN (and optional conv bias) into the conv weights.

    Returns (W_scaled, shift): W_scaled (Cout, 9*Cin), rows ordered tap-major /
    input-channel-minor (matching _im2col_taps); shift (Cout, 1).
    """
    kh, kw, cin, cout = w_hwio.shape
    s = gamma / jnp.sqrt(var + eps)
    wf = w_hwio.reshape(kh * kw * cin, cout).T * s[:, None]      # (Cout, 9*Cin)
    b = beta - mean * s
    if bias is not None:
        b = b + bias * s
    return wf, b[:, None]


def _tap_masks(H, W):
    """(9, H*W) 0/1 masks: validity of each 3x3 tap under zero 'same' padding."""
    p = jnp.arange(H * W)
    y, x = p // W, p % W
    rows = []
    for ky in range(3):
        for kx in range(3):
            sy, sx = ky - 1, kx - 1
            ok = (y + sy >= 0) & (y + sy < H) & (x + sx >= 0) & (x + sx < W)
            rows.append(ok.astype(jnp.float32))
    return jnp.stack(rows, axis=0)


def _pool_matrix(H, W):
    """(H*W, Hl*Wl) matrix implementing AvgPool2d(2,2) on flat spatial.

    Floors odd spatial dims exactly like PyTorch AvgPool2d(2, 2).
    """
    Hl, Wl = H // 2, W // 2
    q = jnp.arange(H * W)
    qy, qx = q // W, q % W
    ry, rx = qy // 2, qx // 2
    valid = (ry < Hl) & (rx < Wl)
    r = jnp.where(valid, ry * Wl + rx, Hl * Wl)   # out-of-range -> dropped row
    return jax.nn.one_hot(r, Hl * Wl, dtype=jnp.float32) * 0.25


# ----------------------------------------------------------------------------
# Parameter construction (deterministic, synthetic — not a checkpoint load)
# ----------------------------------------------------------------------------
def init_params(key, inplanes, planes, base_width=64, groups=1, alpha_out=0.5):
    width = int(planes * (base_width / 64.0)) * groups
    c_l = int(alpha_out * width)        # low-frequency output channels
    c_h = width - c_l                   # high-frequency output channels

    ks = jax.random.split(key, 8)
    p = {
        # Conv2d(inplanes, planes, 3, padding=1), bias=True
        "conv1_w": 0.1 * jax.random.normal(ks[0], (3, 3, inplanes, planes), jnp.float32),
        "conv1_b": 0.1 * jax.random.normal(ks[1], (planes,), jnp.float32),
        # BatchNorm2d(planes) — inference-mode stats
        "bn1_gamma": 1.0 + 0.1 * jax.random.normal(ks[2], (planes,), jnp.float32),
        "bn1_beta": 0.1 * jax.random.normal(ks[3], (planes,), jnp.float32),
        "bn1_mean": 0.05 * jnp.arange(planes, dtype=jnp.float32),
        "bn1_var": 1.0 + 0.01 * jnp.arange(planes, dtype=jnp.float32),
        # OctaveConv branches (bias=False)
        "w_h2h": 0.1 * jax.random.normal(ks[4], (3, 3, planes, c_h), jnp.float32),
        "w_h2l": 0.1 * jax.random.normal(ks[5], (3, 3, planes, c_l), jnp.float32),
        # bn_h / bn_l
        "bnh_gamma": 1.0 + 0.1 * jax.random.normal(ks[6], (c_h,), jnp.float32),
        "bnh_beta": jnp.zeros((c_h,), jnp.float32),
        "bnh_mean": 0.02 * jnp.arange(c_h, dtype=jnp.float32),
        "bnh_var": 1.0 + 0.02 * jnp.arange(c_h, dtype=jnp.float32),
        "bnl_gamma": 1.0 + 0.1 * jax.random.normal(ks[7], (c_l,), jnp.float32),
        "bnl_beta": jnp.zeros((c_l,), jnp.float32),
        "bnl_mean": 0.03 * jnp.arange(c_l, dtype=jnp.float32),
        "bnl_var": 1.0 + 0.03 * jnp.arange(c_l, dtype=jnp.float32),
    }
    return p


# ----------------------------------------------------------------------------
# inconv forward (single fused pallas_call)
# ----------------------------------------------------------------------------
def inconv_forward(x_nchw, params):
    N, cin, H, W = x_nchw.shape
    planes = params["conv1_w"].shape[-1]
    c_h = params["w_h2h"].shape[-1]
    c_l = params["w_h2l"].shape[-1]
    HW = H * W
    Hl, Wl = H // 2, W // 2
    HWl = Hl * Wl

    # Fold BN scale (and conv1 bias) into the matmul weights — only a per-channel
    # shift remains in the kernel epilogue.
    w1, b1 = _fold_conv_bn(params["conv1_w"], params["bn1_gamma"],
                           params["bn1_beta"], params["bn1_mean"],
                           params["bn1_var"], bias=params["conv1_b"])
    wh, bh = _fold_conv_bn(params["w_h2h"], params["bnh_gamma"],
                           params["bnh_beta"], params["bnh_mean"],
                           params["bnh_var"])
    wl, bl = _fold_conv_bn(params["w_h2l"], params["bnl_gamma"],
                           params["bnl_beta"], params["bnl_mean"],
                           params["bnl_var"])
    pool = _pool_matrix(H, W)
    mh = _tap_masks(H, W)
    ml = _tap_masks(Hl, Wl)

    # NCHW -> (N, C, H*W) is a free reshape (no transpose); outputs come back in
    # the same lane-dense layout and are reshaped back to NCHW for free.
    x_flat = x_nchw.reshape(N, cin, HW).astype(jnp.float32)

    kernel = functools.partial(_inconv_kernel, W=W, Wl=Wl)
    yh_flat, yl_flat = pl.pallas_call(
        kernel,
        out_shape=(jax.ShapeDtypeStruct((N, c_h, HW), jnp.float32),
                   jax.ShapeDtypeStruct((N, c_l, HWl), jnp.float32)),
        grid_spec=pltpu.PrefetchScalarGridSpec(
            num_scalar_prefetch=0,
            grid=(N,),
            in_specs=[
                pl.BlockSpec((1, cin, HW), lambda n: (n, 0, 0)),       # x
                pl.BlockSpec((planes, 9 * cin), lambda n: (0, 0)),     # w1 (BN-folded)
                pl.BlockSpec((planes, 1), lambda n: (0, 0)),           # shift1
                pl.BlockSpec((c_h, 9 * planes), lambda n: (0, 0)),     # w_h2h
                pl.BlockSpec((c_h, 1), lambda n: (0, 0)),              # shift_h
                pl.BlockSpec((c_l, 9 * planes), lambda n: (0, 0)),     # w_h2l
                pl.BlockSpec((c_l, 1), lambda n: (0, 0)),              # shift_l
                pl.BlockSpec((HW, HWl), lambda n: (0, 0)),             # avg-pool matrix
                pl.BlockSpec((9, HW), lambda n: (0, 0)),               # tap masks (full res)
                pl.BlockSpec((9, HWl), lambda n: (0, 0)),              # tap masks (half res)
            ],
            out_specs=[
                pl.BlockSpec((1, c_h, HW), lambda n: (n, 0, 0)),
                pl.BlockSpec((1, c_l, HWl), lambda n: (n, 0, 0)),
            ],
        ),
        compiler_params=pltpu.CompilerParams(
            dimension_semantics=("parallel",),      # v7x: batch sharded over 2 TCs
            vmem_limit_bytes=32 * 1024 * 1024,
        ),
    )(x_flat, w1, b1, wh, bh, wl, bl, pool, mh, ml)

    return (yh_flat.reshape(N, c_h, H, W),
            yl_flat.reshape(N, c_l, Hl, Wl))


# ----------------------------------------------------------------------------
# Pure-XLA reference (for the correctness check)
# ----------------------------------------------------------------------------
def _reference_forward(x_nchw, params):
    dn = ("NCHW", "HWIO", "NCHW")
    prec = jax.lax.Precision.HIGHEST

    def conv(x, w):
        return jax.lax.conv_general_dilated(x, w, (1, 1), "SAME",
                                            dimension_numbers=dn, precision=prec)

    def bn(x, gamma, beta, mean, var):
        s = gamma / jnp.sqrt(var + EPS)
        return x * s[None, :, None, None] + (beta - mean * s)[None, :, None, None]

    x = x_nchw.astype(jnp.float32)
    h = conv(x, params["conv1_w"]) + params["conv1_b"][None, :, None, None]
    h = jnp.maximum(bn(h, params["bn1_gamma"], params["bn1_beta"],
                       params["bn1_mean"], params["bn1_var"]), 0.0)
    yh = jnp.maximum(bn(conv(h, params["w_h2h"]), params["bnh_gamma"],
                        params["bnh_beta"], params["bnh_mean"],
                        params["bnh_var"]), 0.0)
    N, C, H, W = h.shape
    hp = h.reshape(N, C, H // 2, 2, W // 2, 2).mean(axis=(3, 5))
    yl = jnp.maximum(bn(conv(hp, params["w_h2l"]), params["bnl_gamma"],
                        params["bnl_beta"], params["bnl_mean"],
                        params["bnl_var"]), 0.0)
    return yh, yl


if __name__ == "__main__":
    key = jax.random.PRNGKey(0)
    k_x, k_p = jax.random.split(key)

    # small shapes: batch=2, inplanes=4, planes=8, spatial=16x16
    inplanes, planes = 4, 8
    x = jax.random.normal(k_x, (2, inplanes, 16, 16), jnp.float32)
    params = init_params(k_p, inplanes, planes)

    y_h, y_l = jax.jit(inconv_forward)(x, params)
    jax.block_until_ready((y_h, y_l))

    assert y_h.shape == (2, 4, 16, 16), y_h.shape   # (N, width//2, H,   W)
    assert y_l.shape == (2, 4, 8, 8), y_l.shape     # (N, width//2, H/2, W/2)
    assert bool(jnp.all(jnp.isfinite(y_h))) and bool(jnp.all(jnp.isfinite(y_l)))
    assert bool(jnp.all(y_h >= 0)) and bool(jnp.all(y_l >= 0))  # ReLU applied

    # numerical check vs a pure-XLA reference (tolerance covers MXU f32 rounding)
    r_h, r_l = jax.jit(_reference_forward)(x, params)
    assert float(jnp.max(jnp.abs(y_h - r_h))) < 2e-2, float(jnp.max(jnp.abs(y_h - r_h)))
    assert float(jnp.max(jnp.abs(y_l - r_l))) < 2e-2, float(jnp.max(jnp.abs(y_l - r_l)))

    print("KERNEL_OK")
</pallas_src>

<mosaic_0001>
module attributes {stable_mosaic.version = 11 : i64} {
  func.func @_inconv_kernel(%arg0: i32, %arg1: memref<1x4x256xf32, #tpu.memory_space<vmem>>, %arg2: memref<8x36xf32, #tpu.memory_space<vmem>>, %arg3: memref<8x1xf32, #tpu.memory_space<vmem>>, %arg4: memref<4x72xf32, #tpu.memory_space<vmem>>, %arg5: memref<4x1xf32, #tpu.memory_space<vmem>>, %arg6: memref<4x72xf32, #tpu.memory_space<vmem>>, %arg7: memref<4x1xf32, #tpu.memory_space<vmem>>, %arg8: memref<256x64xf32, #tpu.memory_space<vmem>>, %arg9: memref<9x256xf32, #tpu.memory_space<vmem>>, %arg10: memref<9x64xf32, #tpu.memory_space<vmem>>, %arg11: memref<1x4x256xf32, #tpu.memory_space<vmem>>, %arg12: memref<1x4x64xf32, #tpu.memory_space<vmem>>) attributes {dimension_semantics = [#tpu.dimension_semantics<parallel>], iteration_bounds = array<i64: 2>, scalar_prefetch = 0 : i64, scratch_operands = 0 : i64, tpu.core_type = #tpu.core_type<tc>, window_params = [{transform_indices = @transform_0, window_bounds = array<i64: 1, 4, 256>}, {pipeline_mode = #tpu.pipeline_mode<synchronous>, transform_indices = @transform_1, window_bounds = array<i64: 8, 36>}, {pipeline_mode = #tpu.pipeline_mode<synchronous>, transform_indices = @transform_2, window_bounds = array<i64: 8, 1>}, {pipeline_mode = #tpu.pipeline_mode<synchronous>, transform_indices = @transform_3, window_bounds = array<i64: 4, 72>}, {pipeline_mode = #tpu.pipeline_mode<synchronous>, transform_indices = @transform_4, window_bounds = array<i64: 4, 1>}, {pipeline_mode = #tpu.pipeline_mode<synchronous>, transform_indices = @transform_5, window_bounds = array<i64: 4, 72>}, {pipeline_mode = #tpu.pipeline_mode<synchronous>, transform_indices = @transform_6, window_bounds = array<i64: 4, 1>}, {pipeline_mode = #tpu.pipeline_mode<synchronous>, transform_indices = @transform_7, window_bounds = array<i64: 256, 64>}, {pipeline_mode = #tpu.pipeline_mode<synchronous>, transform_indices = @transform_8, window_bounds = array<i64: 9, 256>}, {pipeline_mode = #tpu.pipeline_mode<synchronous>, transform_indices = @transform_9, window_bounds = array<i64: 9, 64>}, {transform_indices = @transform_10, window_bounds = array<i64: 1, 4, 256>}, {transform_indices = @transform_11, window_bounds = array<i64: 1, 4, 64>}]} {
    %c0 = arith.constant 0 : index
    %c0_0 = arith.constant 0 : index
    %c0_1 = arith.constant 0 : index
    %0 = vector.load %arg1[%c0, %c0_0, %c0_1] : memref<1x4x256xf32, #tpu.memory_space<vmem>>, vector<1x4x256xf32>
    %1 = vector.shape_cast %0 : vector<1x4x256xf32> to vector<4x256xf32>
    %c0_2 = arith.constant 0 : index
    %c0_3 = arith.constant 0 : index
    %2 = vector.load %arg9[%c0_2, %c0_3] : memref<9x256xf32, #tpu.memory_space<vmem>>, vector<9x256xf32>
    %c0_4 = arith.constant 0 : index
    %c0_5 = arith.constant 0 : index
    %3 = vector.load %arg10[%c0_4, %c0_5] : memref<9x64xf32, #tpu.memory_space<vmem>>, vector<9x64xf32>
    %c17_i32 = arith.constant 17 : i32
    %4 = tpu.dynamic_rotate %1 by %c17_i32 dim 1 : vector<4x256xf32>, i32 -> vector<4x256xf32>
    %5 = vector.extract_strided_slice %2 {offsets = [0, 0], sizes = [1, 256], strides = [1, 1]} : vector<9x256xf32> to vector<1x256xf32>
    %6 = vector.broadcast %5 : vector<1x256xf32> to vector<4x256xf32>
    %7 = arith.mulf %4, %6 : vector<4x256xf32>
    %c16_i32 = arith.constant 16 : i32
    %8 = tpu.dynamic_rotate %1 by %c16_i32 dim 1 : vector<4x256xf32>, i32 -> vector<4x256xf32>
    %9 = vector.extract_strided_slice %2 {offsets = [1, 0], sizes = [1, 256], strides = [1, 1]} : vector<9x256xf32> to vector<1x256xf32>
    %10 = vector.broadcast %9 : vector<1x256xf32> to vector<4x256xf32>
    %11 = arith.mulf %8, %10 : vector<4x256xf32>
    %c15_i32 = arith.constant 15 : i32
    %12 = tpu.dynamic_rotate %1 by %c15_i32 dim 1 : vector<4x256xf32>, i32 -> vector<4x256xf32>
    %13 = vector.extract_strided_slice %2 {offsets = [2, 0], sizes = [1, 256], strides = [1, 1]} : vector<9x256xf32> to vector<1x256xf32>
    %14 = vector.broadcast %13 : vector<1x256xf32> to vector<4x256xf32>
    %15 = arith.mulf %12, %14 : vector<4x256xf32>
    %c1_i32 = arith.constant 1 : i32
    %16 = tpu.dynamic_rotate %1 by %c1_i32 dim 1 : vector<4x256xf32>, i32 -> vector<4x256xf32>
    %17 = vector.extract_strided_slice %2 {offsets = [3, 0], sizes = [1, 256], strides = [1, 1]} : vector<9x256xf32> to vector<1x256xf32>
    %18 = vector.broadcast %17 : vector<1x256xf32> to vector<4x256xf32>
    %19 = arith.mulf %16, %18 : vector<4x256xf32>
    %c255_i32 = arith.constant 255 : i32
    %20 = tpu.dynamic_rotate %1 by %c255_i32 dim 1 : vector<4x256xf32>, i32 -> vector<4x256xf32>
    %21 = vector.extract_strided_slice %2 {offsets = [5, 0], sizes = [1, 256], strides = [1, 1]} : vector<9x256xf32> to vector<1x256xf32>
    %22 = vector.broadcast %21 : vector<1x256xf32> to vector<4x256xf32>
    %23 = arith.mulf %20, %22 : vector<4x256xf32>
    %c241_i32 = arith.constant 241 : i32
    %24 = tpu.dynamic_rotate %1 by %c241_i32 dim 1 : vector<4x256xf32>, i32 -> vector<4x256xf32>
    %25 = vector.extract_strided_slice %2 {offsets = [6, 0], sizes = [1, 256], strides = [1, 1]} : vector<9x256xf32> to vector<1x256xf32>
    %26 = vector.broadcast %25 : vector<1x256xf32> to vector<4x256xf32>
    %27 = arith.mulf %24, %26 : vector<4x256xf32>
    %c240_i32 = arith.constant 240 : i32
    %28 = tpu.dynamic_rotate %1 by %c240_i32 dim 1 : vector<4x256xf32>, i32 -> vector<4x256xf32>
    %29 = vector.extract_strided_slice %2 {offsets = [7, 0], sizes = [1, 256], strides = [1, 1]} : vector<9x256xf32> to vector<1x256xf32>
    %30 = vector.broadcast %29 : vector<1x256xf32> to vector<4x256xf32>
    %31 = arith.mulf %28, %30 : vector<4x256xf32>
    %c239_i32 = arith.constant 239 : i32
    %32 = tpu.dynamic_rotate %1 by %c239_i32 dim 1 : vector<4x256xf32>, i32 -> vector<4x256xf32>
    %33 = vector.extract_strided_slice %2 {offsets = [8, 0], sizes = [1, 256], strides = [1, 1]} : vector<9x256xf32> to vector<1x256xf32>
    %34 = vector.broadcast %33 : vector<1x256xf32> to vector<4x256xf32>
    %35 = arith.mulf %32, %34 : vector<4x256xf32>
    %36 = tpu.concatenate %7, %11, %15, %19, %1, %23, %27, %31, %35 in 0 : vector<4x256xf32>, vector<4x256xf32>, vector<4x256xf32>, vector<4x256xf32>, vector<4x256xf32>, vector<4x256xf32>, vector<4x256xf32>, vector<4x256xf32>, vector<4x256xf32> -> vector<36x256xf32>
    %c0_6 = arith.constant 0 : index
    %c0_7 = arith.constant 0 : index
    %37 = vector.load %arg2[%c0_6, %c0_7] : memref<8x36xf32, #tpu.memory_space<vmem>>, vector<8x36xf32>
    %cst = arith.constant dense<0.000000e+00> : vector<8x256xf32>
    %38 = tpu.matmul %37, %36, %cst {dimension_numbers = #tpu.dot_dimension_numbers<[1], [0], [0], [1], [0, 0, 1, 1], [], []>} : vector<8x36xf32>, vector<36x256xf32>, vector<8x256xf32> -> vector<8x256xf32>
    %c0_8 = arith.constant 0 : index
    %c0_9 = arith.constant 0 : index
    %39 = vector.load %arg3[%c0_8, %c0_9] : memref<8x1xf32, #tpu.memory_space<vmem>>, vector<8x1xf32>
    %40 = vector.broadcast %39 : vector<8x1xf32> to vector<8x256xf32>
    %41 = arith.addf %38, %40 : vector<8x256xf32>
    %cst_10 = arith.constant 0.000000e+00 : f32
    %42 = vector.broadcast %cst_10 : f32 to vector<8x256xf32>
    %43 = arith.maximumf %41, %42 : vector<8x256xf32>
    %c17_i32_11 = arith.constant 17 : i32
    %44 = tpu.dynamic_rotate %43 by %c17_i32_11 dim 1 : vector<8x256xf32>, i32 -> vector<8x256xf32>
    %45 = vector.extract_strided_slice %2 {offsets = [0, 0], sizes = [1, 256], strides = [1, 1]} : vector<9x256xf32> to vector<1x256xf32>
    %46 = vector.broadcast %45 : vector<1x256xf32> to vector<8x256xf32>
    %47 = arith.mulf %44, %46 : vector<8x256xf32>
    %c16_i32_12 = arith.constant 16 : i32
    %48 = tpu.dynamic_rotate %43 by %c16_i32_12 dim 1 : vector<8x256xf32>, i32 -> vector<8x256xf32>
    %49 = vector.extract_strided_slice %2 {offsets = [1, 0], sizes = [1, 256], strides = [1, 1]} : vector<9x256xf32> to vector<1x256xf32>
    %50 = vector.broadcast %49 : vector<1x256xf32> to vector<8x256xf32>
    %51 = arith.mulf %48, %50 : vector<8x256xf32>
    %c15_i32_13 = arith.constant 15 : i32
    %52 = tpu.dynamic_rotate %43 by %c15_i32_13 dim 1 : vector<8x256xf32>, i32 -> vector<8x256xf32>
    %53 = vector.extract_strided_slice %2 {offsets = [2, 0], sizes = [1, 256], strides = [1, 1]} : vector<9x256xf32> to vector<1x256xf32>
    %54 = vector.broadcast %53 : vector<1x256xf32> to vector<8x256xf32>
    %55 = arith.mulf %52, %54 : vector<8x256xf32>
    %c1_i32_14 = arith.constant 1 : i32
    %56 = tpu.dynamic_rotate %43 by %c1_i32_14 dim 1 : vector<8x256xf32>, i32 -> vector<8x256xf32>
    %57 = vector.extract_strided_slice %2 {offsets = [3, 0], sizes = [1, 256], strides = [1, 1]} : vector<9x256xf32> to vector<1x256xf32>
    %58 = vector.broadcast %57 : vector<1x256xf32> to vector<8x256xf32>
    %59 = arith.mulf %56, %58 : vector<8x256xf32>
    %c255_i32_15 = arith.constant 255 : i32
    %60 = tpu.dynamic_rotate %43 by %c255_i32_15 dim 1 : vector<8x256xf32>, i32 -> vector<8x256xf32>
    %61 = vector.extract_strided_slice %2 {offsets = [5, 0], sizes = [1, 256], strides = [1, 1]} : vector<9x256xf32> to vector<1x256xf32>
    %62 = vector.broadcast %61 : vector<1x256xf32> to vector<8x256xf32>
    %63 = arith.mulf %60, %62 : vector<8x256xf32>
    %c241_i32_16 = arith.constant 241 : i32
    %64 = tpu.dynamic_rotate %43 by %c241_i32_16 dim 1 : vector<8x256xf32>, i32 -> vector<8x256xf32>
    %65 = vector.extract_strided_slice %2 {offsets = [6, 0], sizes = [1, 256], strides = [1, 1]} : vector<9x256xf32> to vector<1x256xf32>
    %66 = vector.broadcast %65 : vector<1x256xf32> to vector<8x256xf32>
    %67 = arith.mulf %64, %66 : vector<8x256xf32>
    %c240_i32_17 = arith.constant 240 : i32
    %68 = tpu.dynamic_rotate %43 by %c240_i32_17 dim 1 : vector<8x256xf32>, i32 -> vector<8x256xf32>
    %69 = vector.extract_strided_slice %2 {offsets = [7, 0], sizes = [1, 256], strides = [1, 1]} : vector<9x256xf32> to vector<1x256xf32>
    %70 = vector.broadcast %69 : vector<1x256xf32> to vector<8x256xf32>
    %71 = arith.mulf %68, %70 : vector<8x256xf32>
    %c239_i32_18 = arith.constant 239 : i32
    %72 = tpu.dynamic_rotate %43 by %c239_i32_18 dim 1 : vector<8x256xf32>, i32 -> vector<8x256xf32>
    %73 = vector.extract_strided_slice %2 {offsets = [8, 0], sizes = [1, 256], strides = [1, 1]} : vector<9x256xf32> to vector<1x256xf32>
    %74 = vector.broadcast %73 : vector<1x256xf32> to vector<8x256xf32>
    %75 = arith.mulf %72, %74 : vector<8x256xf32>
    %76 = tpu.concatenate %47, %51, %55, %59, %43, %63, %67, %71, %75 in 0 : vector<8x256xf32>, vector<8x256xf32>, vector<8x256xf32>, vector<8x256xf32>, vector<8x256xf32>, vector<8x256xf32>, vector<8x256xf32>, vector<8x256xf32>, vector<8x256xf32> -> vector<72x256xf32>
    %c0_19 = arith.constant 0 : index
    %c0_20 = arith.constant 0 : index
    %77 = vector.load %arg4[%c0_19, %c0_20] : memref<4x72xf32, #tpu.memory_space<vmem>>, vector<4x72xf32>
    %cst_21 = arith.constant dense<0.000000e+00> : vector<4x256xf32>
    %78 = tpu.matmul %77, %76, %cst_21 {dimension_numbers = #tpu.dot_dimension_numbers<[1], [0], [0], [1], [0, 0, 1, 1], [], []>} : vector<4x72xf32>, vector<72x256xf32>, vector<4x256xf32> -> vector<4x256xf32>
    %c0_22 = arith.constant 0 : index
    %c0_23 = arith.constant 0 : index
    %79 = vector.load %arg5[%c0_22, %c0_23] : memref<4x1xf32, #tpu.memory_space<vmem>>, vector<4x1xf32>
    %80 = vector.broadcast %79 : vector<4x1xf32> to vector<4x256xf32>
    %81 = arith.addf %78, %80 : vector<4x256xf32>
    %cst_24 = arith.constant 0.000000e+00 : f32
    %82 = vector.broadcast %cst_24 : f32 to vector<4x256xf32>
    %83 = arith.maximumf %81, %82 : vector<4x256xf32>
    %c0_25 = arith.constant 0 : index
    %c0_26 = arith.constant 0 : index
    %c0_27 = arith.constant 0 : index
    %84 = vector.load %arg11[%c0_25, %c0_26, %c0_27] : memref<1x4x256xf32, #tpu.memory_space<vmem>>, vector<1x4x256xf32>
    %85 = vector.shape_cast %84 : vector<1x4x256xf32> to vector<4x256xf32>
    %86 = vector.shape_cast %83 : vector<4x256xf32> to vector<1x4x256xf32>
    tpu.vector_store %arg11[%c0_25, %c0_26, %c0_27], %86 {strides = array<i32>} : memref<1x4x256xf32, #tpu.memory_space<vmem>>, vector<1x4x256xf32>,
    %c0_28 = arith.constant 0 : index
    %c0_29 = arith.constant 0 : index
    %87 = vector.load %arg8[%c0_28, %c0_29] : memref<256x64xf32, #tpu.memory_space<vmem>>, vector<256x64xf32>
    %cst_30 = arith.constant dense<0.000000e+00> : vector<8x64xf32>
    %88 = tpu.matmul %43, %87, %cst_30 {dimension_numbers = #tpu.dot_dimension_numbers<[1], [0], [0], [1], [0, 0, 1, 1], [], []>} : vector<8x256xf32>, vector<256x64xf32>, vector<8x64xf32> -> vector<8x64xf32>
    %c9_i32 = arith.constant 9 : i32
    %89 = tpu.dynamic_rotate %88 by %c9_i32 dim 1 : vector<8x64xf32>, i32 -> vector<8x64xf32>
    %90 = vector.extract_strided_slice %3 {offsets = [0, 0], sizes = [1, 64], strides = [1, 1]} : vector<9x64xf32> to vector<1x64xf32>
    %91 = vector.broadcast %90 : vector<1x64xf32> to vector<8x64xf32>
    %92 = arith.mulf %89, %91 : vector<8x64xf32>
    %c8_i32 = arith.constant 8 : i32
    %93 = tpu.dynamic_rotate %88 by %c8_i32 dim 1 : vector<8x64xf32>, i32 -> vector<8x64xf32>
    %94 = vector.extract_strided_slice %3 {offsets = [1, 0], sizes = [1, 64], strides = [1, 1]} : vector<9x64xf32> to vector<1x64xf32>
    %95 = vector.broadcast %94 : vector<1x64xf32> to vector<8x64xf32>
    %96 = arith.mulf %93, %95 : vector<8x64xf32>
    %c7_i32 = arith.constant 7 : i32
    %97 = tpu.dynamic_rotate %88 by %c7_i32 dim 1 : vector<8x64xf32>, i32 -> vector<8x64xf32>
    %98 = vector.extract_strided_slice %3 {offsets = [2, 0], sizes = [1, 64], strides = [1, 1]} : vector<9x64xf32> to vector<1x64xf32>
    %99 = vector.broadcast %98 : vector<1x64xf32> to vector<8x64xf32>
    %100 = arith.mulf %97, %99 : vector<8x64xf32>
    %c1_i32_31 = arith.constant 1 : i32
    %101 = tpu.dynamic_rotate %88 by %c1_i32_31 dim 1 : vector<8x64xf32>, i32 -> vector<8x64xf32>
    %102 = vector.extract_strided_slice %3 {offsets = [3, 0], sizes = [1, 64], strides = [1, 1]} : vector<9x64xf32> to vector<1x64xf32>
    %103 = vector.broadcast %102 : vector<1x64xf32> to vector<8x64xf32>
    %104 = arith.mulf %101, %103 : vector<8x64xf32>
    %c63_i32 = arith.constant 63 : i32
    %105 = tpu.dynamic_rotate %88 by %c63_i32 dim 1 : vector<8x64xf32>, i32 -> vector<8x64xf32>
    %106 = vector.extract_strided_slice %3 {offsets = [5, 0], sizes = [1, 64], strides = [1, 1]} : vector<9x64xf32> to vector<1x64xf32>
    %107 = vector.broadcast %106 : vector<1x64xf32> to vector<8x64xf32>
    %108 = arith.mulf %105, %107 : vector<8x64xf32>
    %c57_i32 = arith.constant 57 : i32
    %109 = tpu.dynamic_rotate %88 by %c57_i32 dim 1 : vector<8x64xf32>, i32 -> vector<8x64xf32>
    %110 = vector.extract_strided_slice %3 {offsets = [6, 0], sizes = [1, 64], strides = [1, 1]} : vector<9x64xf32> to vector<1x64xf32>
    %111 = vector.broadcast %110 : vector<1x64xf32> to vector<8x64xf32>
    %112 = arith.mulf %109, %111 : vector<8x64xf32>
    %c56_i32 = arith.constant 56 : i32
    %113 = tpu.dynamic_rotate %88 by %c56_i32 dim 1 : vector<8x64xf32>, i32 -> vector<8x64xf32>
    %114 = vector.extract_strided_slice %3 {offsets = [7, 0], sizes = [1, 64], strides = [1, 1]} : vector<9x64xf32> to vector<1x64xf32>
    %115 = vector.broadcast %114 : vector<1x64xf32> to vector<8x64xf32>
    %116 = arith.mulf %113, %115 : vector<8x64xf32>
    %c55_i32 = arith.constant 55 : i32
    %117 = tpu.dynamic_rotate %88 by %c55_i32 dim 1 : vector<8x64xf32>, i32 -> vector<8x64xf32>
    %118 = vector.extract_strided_slice %3 {offsets = [8, 0], sizes = [1, 64], strides = [1, 1]} : vector<9x64xf32> to vector<1x64xf32>
    %119 = vector.broadcast %118 : vector<1x64xf32> to vector<8x64xf32>
    %120 = arith.mulf %117, %119 : vector<8x64xf32>
    %121 = tpu.concatenate %92, %96, %100, %104, %88, %108, %112, %116, %120 in 0 : vector<8x64xf32>, vector<8x64xf32>, vector<8x64xf32>, vector<8x64xf32>, vector<8x64xf32>, vector<8x64xf32>, vector<8x64xf32>, vector<8x64xf32>, vector<8x64xf32> -> vector<72x64xf32>
    %c0_32 = arith.constant 0 : index
    %c0_33 = arith.constant 0 : index
    %122 = vector.load %arg6[%c0_32, %c0_33] : memref<4x72xf32, #tpu.memory_space<vmem>>, vector<4x72xf32>
    %cst_34 = arith.constant dense<0.000000e+00> : vector<4x64xf32>
    %123 = tpu.matmul %122, %121, %cst_34 {dimension_numbers = #tpu.dot_dimension_numbers<[1], [0], [0], [1], [0, 0, 1, 1], [], []>} : vector<4x72xf32>, vector<72x64xf32>, vector<4x64xf32> -> vector<4x64xf32>
    %c0_35 = arith.constant 0 : index
    %c0_36 = arith.constant 0 : index
    %124 = vector.load %arg7[%c0_35, %c0_36] : memref<4x1xf32, #tpu.memory_space<vmem>>, vector<4x1xf32>
    %125 = vector.broadcast %124 : vector<4x1xf32> to vector<4x64xf32>
    %126 = arith.addf %123, %125 : vector<4x64xf32>
    %cst_37 = arith.constant 0.000000e+00 : f32
    %127 = vector.broadcast %cst_37 : f32 to vector<4x64xf32>
    %128 = arith.maximumf %126, %127 : vector<4x64xf32>
    %c0_38 = arith.constant 0 : index
    %c0_39 = arith.constant 0 : index
    %c0_40 = arith.constant 0 : index
    %129 = vector.load %arg12[%c0_38, %c0_39, %c0_40] : memref<1x4x64xf32, #tpu.memory_space<vmem>>, vector<1x4x64xf32>
    %130 = vector.shape_cast %129 : vector<1x4x64xf32> to vector<4x64xf32>
    %131 = vector.shape_cast %128 : vector<4x64xf32> to vector<1x4x64xf32>
    tpu.vector_store %arg12[%c0_38, %c0_39, %c0_40], %131 {strides = array<i32>} : memref<1x4x64xf32, #tpu.memory_space<vmem>>, vector<1x4x64xf32>,
    return
  }
  func.func @transform_0(%arg0: i32) -> (i32, i32, i32) {
    %c0_i32 = arith.constant 0 : i32
    %c0_i32_0 = arith.constant 0 : i32
    %c0_i32_1 = arith.constant 0 : i32
    return %arg0, %c0_i32, %c0_i32_0 : i32, i32, i32
  }
  func.func @transform_1(%arg0: i32) -> (i32, i32) {
    %c0_i32 = arith.constant 0 : i32
    %c0_i32_0 = arith.constant 0 : i32
    %c0_i32_1 = arith.constant 0 : i32
    return %c0_i32, %c0_i32_0 : i32, i32
  }
  func.func @transform_2(%arg0: i32) -> (i32, i32) {
    %c0_i32 = arith.constant 0 : i32
    %c0_i32_0 = arith.constant 0 : i32
    %c0_i32_1 = arith.constant 0 : i32
    return %c0_i32, %c0_i32_0 : i32, i32
  }
  func.func @transform_3(%arg0: i32) -> (i32, i32) {
    %c0_i32 = arith.constant 0 : i32
    %c0_i32_0 = arith.constant 0 : i32
    %c0_i32_1 = arith.constant 0 : i32
    return %c0_i32, %c0_i32_0 : i32, i32
  }
  func.func @transform_4(%arg0: i32) -> (i32, i32) {
    %c0_i32 = arith.constant 0 : i32
    %c0_i32_0 = arith.constant 0 : i32
    %c0_i32_1 = arith.constant 0 : i32
    return %c0_i32, %c0_i32_0 : i32, i32
  }
  func.func @transform_5(%arg0: i32) -> (i32, i32) {
    %c0_i32 = arith.constant 0 : i32
    %c0_i32_0 = arith.constant 0 : i32
    %c0_i32_1 = arith.constant 0 : i32
    return %c0_i32, %c0_i32_0 : i32, i32
  }
  func.func @transform_6(%arg0: i32) -> (i32, i32) {
    %c0_i32 = arith.constant 0 : i32
    %c0_i32_0 = arith.constant 0 : i32
    %c0_i32_1 = arith.constant 0 : i32
    return %c0_i32, %c0_i32_0 : i32, i32
  }
  func.func @transform_7(%arg0: i32) -> (i32, i32) {
    %c0_i32 = arith.constant 0 : i32
    %c0_i32_0 = arith.constant 0 : i32
    %c0_i32_1 = arith.constant 0 : i32
    return %c0_i32, %c0_i32_0 : i32, i32
  }
  func.func @transform_8(%arg0: i32) -> (i32, i32) {
    %c0_i32 = arith.constant 0 : i32
    %c0_i32_0 = arith.constant 0 : i32
    %c0_i32_1 = arith.constant 0 : i32
    return %c0_i32, %c0_i32_0 : i32, i32
  }
  func.func @transform_9(%arg0: i32) -> (i32, i32) {
    %c0_i32 = arith.constant 0 : i32
    %c0_i32_0 = arith.constant 0 : i32
    %c0_i32_1 = arith.constant 0 : i32
    return %c0_i32, %c0_i32_0 : i32, i32
  }
  func.func @transform_10(%arg0: i32) -> (i32, i32, i32) {
    %c0_i32 = arith.constant 0 : i32
    %c0_i32_0 = arith.constant 0 : i32
    %c0_i32_1 = arith.constant 0 : i32
    return %arg0, %c0_i32, %c0_i32_0 : i32, i32, i32
  }
  func.func @transform_11(%arg0: i32) -> (i32, i32, i32) {
    %c0_i32 = arith.constant 0 : i32
    %c0_i32_0 = arith.constant 0 : i32
    %c0_i32_1 = arith.constant 0 : i32
    return %arg0, %c0_i32, %c0_i32_0 : i32, i32, i32
  }
}

</mosaic_0001>

<bundles_post_ra>
// kernel: inconv_forward.1
= control target key start
LH: loop header
LB: loop body
LE: loop exit
PB: predicated region body
PF: predicated region fallthrough
CT: control target
= control target key end

     0   :  { %s1533_s17 = smov 0   ;;  %s1993_s0 = inlined_call_operand.vmem [shape: f32[2,4,256], index: 0, kind: input, shape index: {}]   ;;  %s1994_s1 = inlined_call_operand.vmem [shape: f32[8,36], index: 1, kind: input, shape index: {}]   ;;  %s1995_s2 = inlined_call_operand.vmem [shape: f32[8,1], index: 2, kind: input, shape index: {}]   ;;  %s1996_s3 = inlined_call_operand.vmem [shape: f32[4,72], index: 3, kind: input, shape index: {}]   ;;  %s1997_s4 = inlined_call_operand.vmem [shape: f32[4,1], index: 4, kind: input, shape index: {}]   ;;  %s1998_s5 = inlined_call_operand.vmem [shape: f32[4,72], index: 5, kind: input, shape index: {}]   ;;  %s1999_s6 = inlined_call_operand.vmem [shape: f32[4,1], index: 6, kind: input, shape index: {}]   ;;  %s2000_s7 = inlined_call_operand.vmem [shape: f32[256,64], index: 7, kind: input, shape index: {}]   ;;  %s2001_s8 = inlined_call_operand.vmem [shape: f32[9,256], index: 8, kind: input, shape index: {}]   ;;  %s2002_s9 = inlined_call_operand.vmem [shape: f32[9,64], index: 9, kind: input, shape index: {}]   ;;  %s2003_s10 = inlined_call_operand.vmem [shape: f32[2,4,256], index: 10, kind: output, shape index: {0}]   ;;  %s2004_s11 = inlined_call_operand.vmem [shape: f32[2,4,64], index: 11, kind: output, shape index: {1}]  }
   0x1 LB: > { %s1224_s18 = sadd.s32 4294967295, %s1444_s17   ;;  %p1228_p0 = scmp.ge.s32.totalorder %s1444_s17, 1  ;;  %s1444_s17 = sphi %s1533_s17, %s22_s17  }
   0x2   : > { %p340_p1 = scmp.lt.s32.totalorder %s1444_s17, 3 }
   0x4   : > { %p341_p2 = pnand %p1228_p0, %p340_p1 }
   0x5   : > { %p384_p3 = scmp.lt.s32.totalorder (!%p341_p2), %s1224_s18, 1  ;;  %s1446_s23 = smov (!%p341_p2), 1   ;;  %v1452_v2 = vmov (!%p341_p2), 0.0   ;;  %v1454_v3 = vmov (!%p341_p2), 0   ;;  %v580_v4 = vld [vmem:[%s1995_s2] sm:$0xff] (!%p341_p2)  ;;  %v412_v5 = vlaneseq (!%p341_p2)  ;;  %v1607_v12 = vld [vmem:[%s2001_s8 + $0x8] sm:$0xff] (!%p341_p2) }
   0x6   : > { %344 = sbr.rel (%p341_p2) target bundleno = 1305 (0x519), region = 60  ;;  %s1447_s24 = smov (!%p341_p2), 16   ;;  %660 = vmatprep.mubr.f32.mxu0 (!%p341_p2), %v1452_v2  ;;  %808 = vmatprep.mubr.f32.mxu1 (!%p341_p2), %v1452_v2  ;;  %v1602_v11 = vld [vmem:[%s2001_s8] sm:$0xff] (!%p341_p2)  ;;  %vm570_vm4 = vcmask (!%p341_p2), 1043456   ;;  %vm586_vm9 = vcmask (!%p341_p2), 293888   ;;  %vm924_vm10 = vcmask (!%p341_p2), 1048064  }
   0x7   : > { %s1448_s25 = smov (!%p341_p2), 17   ;;  %s1449_s26 = smov (!%p341_p2), 15   ;;  %1415 = vset.pattern.permute.xlu0 (!%p341_p2), %v1454_v3  ;;  %1436 = vset.pattern.permute.xlu1 (!%p341_p2), %v1454_v3  ;;  %v1592_v6 = vshrl.u32 (!%p341_p2), %v412_v5, 7  ;;  %v1594_v7 = vand.u32 (!%p341_p2), 127, %v412_v5  ;;  %vm740_vm11 = vcmask (!%p341_p2), 588800   ;;  %vm1472_vm12 = vmmov (!%p341_p2), 0  }
   0x8   : > { %s1450_s27 = smov (!%p341_p2), 127   ;;  %s1451_s28 = smov (!%p341_p2), 112   ;;  %vm1136_vm13 = vcmask (!%p341_p2), 519168  }
   0x9   : > { %s1453_s29 = smov (!%p341_p2), 113   ;;  %s2006_s30 = smov (!%p341_p2), 111   ;;  %v1597_v10 = vsub.s32 (!%p341_p2), 3, %v1592_v6  ;;  %v1610_v13 = vsub.s32 (!%p341_p2), 1, %v1592_v6  ;;  %vm465_vm0 = vcmp.lt.s32.totalorder (!%p341_p2), %v1594_v7, 1  ;;  %v1614_v16 = vsub.s32 (!%p341_p2), 0, %v1592_v6 }
   0xa   : > { %vm431_vm1 = vcmp.lt.s32.totalorder (!%p341_p2), %v1594_v7, 16  ;;  %v1626_v19 = vsub.s32 (!%p341_p2), 2, %v1592_v6  ;;  %vm414_vm2 = vcmp.lt.s32.totalorder (!%p341_p2), %v1594_v7, 17  ;;  %vm448_vm3 = vcmp.lt.s32.totalorder (!%p341_p2), %v1594_v7, 15  ;;  %s1456_s12 = smov (!%p341_p2), 56   ;;  %s1457_s13 = smov (!%p341_p2), 63  }
   0xb   : > { %v1618_v17 = vrot.slane (!%p341_p2), %v1602_v11, %v1597_v10  ;;  %v1622_v18 = vrot.slane (!%p341_p2), %v1607_v12, %v1597_v10  ;;  %v1634_v22 = vrot.slane (!%p341_p2), %v1602_v11, %v1610_v13  ;;  %v1638_v23 = vrot.slane (!%p341_p2), %v1607_v12, %v1610_v13  ;;  %s1458_s14 = smov (!%p341_p2), 7   ;;  %s1459_s20 = smov (!%p341_p2), 9  }
   0xc   : > { %v1643_v24 = vrot.slane (!%p341_p2), %v1602_v11, %v1614_v16  ;;  %v1647_v25 = vrot.slane (!%p341_p2), %v1607_v12, %v1614_v16  ;;  %v1660_v34 = vrot.slane (!%p341_p2), %v1602_v11, %v1626_v19  ;;  %v1664_v35 = vrot.slane (!%p341_p2), %v1607_v12, %v1626_v19  ;;  %s1460_s21 = smov (!%p341_p2), 64   ;;  %s1467_s15 = smov (!%p341_p2), 48  }
   0xd   : > { %s2011_s18 = smov (!%p384_p3, %s1224_s18), 1  ;;  %v1671_v38 = vsub.s32 5, %v1592_v6  ;;  %vm482_vm5 = vcmp.lt.s32.totalorder %v1594_v7, 127  ;;  %v1675_v43 = vsub.s32 7, %v1592_v6  ;;  %vm516_vm6 = vcmp.lt.s32.totalorder %v1594_v7, 112  ;;  %s1468_s16 = smov 47  }
   0xe   : > { %s2005_s19 = sshll.u32 %s2011_s18, 3  ;;  %v1711_v5 = vsub.s32 6, %v1592_v6  ;;  %vm499_vm7 = vcmp.lt.s32.totalorder %v1594_v7, 113  ;;  %vm533_vm8 = vcmp.lt.s32.totalorder %v1594_v7, 111 }
   0xf   : > { %s388_s22 = scalar_lea.vmem %s1993_s0, %s2005_s19  ;;  %v1687_v52 = vrot.slane %v1602_v11, %v1671_v38  ;;  %v1691_v53 = vrot.slane %v1607_v12, %v1671_v38  ;;  %v1704_v3 = vrot.slane %v1602_v11, %v1675_v43  ;;  %s1462_s19 = smov 8  }
  0x10   : > { %v1549_v0 = vld [vmem:[%s388_s22] sm:$0xff]  ;;  %s1461_s22 = smov 57  }
  0x11   : > { %461 = vrot.lane.b32.xlu1 %v1549_v0, %s1446_s23  ;;  %427 = vrot.lane.b32.xlu0 %v1549_v0, %s1447_s24  ;;  %v1557_v1 = vcombine.high %v1549_v0, %v1549_v0 }
  0x15   : > { %408 = vrot.lane.b32.xlu0 %v1549_v0, %s1448_s25  ;;  %463 = vrot.lane.b32.xlu1 %v1557_v1, %s1446_s23 }
  0x19   : > { %410 = vrot.lane.b32.xlu1 %v1557_v1, %s1448_s25  ;;  %429 = vrot.lane.b32.xlu0 %v1557_v1, %s1447_s24 }
  0x1d   : > { %446 = vrot.lane.b32.xlu1 %v1557_v1, %s1449_s26  ;;  %444 = vrot.lane.b32.xlu0 %v1549_v0, %s1449_s26 }
  0x21   : > { %480 = vrot.lane.b32.xlu1 %v1557_v1, %s1450_s27  ;;  %478 = vrot.lane.b32.xlu0 %v1549_v0, %s1450_s27 }
  0x25   : > { %514 = vrot.lane.b32.xlu1 %v1557_v1, %s1451_s28  ;;  %512 = vrot.lane.b32.xlu0 %v1549_v0, %s1451_s28 }
  0x29   : > { %497 = vrot.lane.b32.xlu1 %v1557_v1, %s1453_s29  ;;  %495 = vrot.lane.b32.xlu0 %v1549_v0, %s1453_s29 }
  0x2d   : > { %531 = vrot.lane.b32.xlu1 %v1557_v1, %s2006_s30  ;;  %529 = vrot.lane.b32.xlu0 %v1549_v0, %s2006_s30  ;;  %s1463_s30 = smov 55  }
  0x31   : > { %583 = vperm.xlu0 %1415, %v580_v4   ;;  %v1708_v4 = vrot.slane %v1607_v12, %v1675_v43 }
  0x83   : > { %v462_v8 = vpop.permute.xlu1 %461  ;;  %v428_v9 = vpop.permute.xlu0 %427 }
  0x87   : > { %v409_v14 = vpop.permute.xlu0 %408  ;;  %v464_v15 = vpop.permute.xlu1 %463 }
  0x88   : > { %v466_v20 = vsel %vm465_vm0, %v462_v8, %v464_v15  ;;  %v467_v21 = vsel %vm465_vm0, %v464_v15, %v462_v8 }
  0x89   : > { %v476_v28 = vmul.f32 %v1618_v17, %v467_v21  ;;  %v477_v29 = vmul.f32 %v1622_v18, %v466_v20 }
  0x8b   : > { %v411_v26 = vpop.permute.xlu1 %410  ;;  %v430_v27 = vpop.permute.xlu0 %429  ;;  %v554_v44 = vrot.slane %v476_v28, 4  ;;  %v555_v45 = vrot.slane %v477_v29, 4  ;;  %v1728_v28 = vrot.slane %v1607_v12, %v1711_v5  ;;  %v1740_v12 = vld [vmem:[%s2001_s8 + $0x18] ss:$0 sm:$0xff] }
  0x8c   : > { %v432_v30 = vsel %vm431_vm1, %v428_v9, %v430_v27  ;;  %v433_v31 = vsel %vm431_vm1, %v430_v27, %v428_v9  ;;  %v415_v36 = vsel %vm414_vm2, %v409_v14, %v411_v26  ;;  %v416_v37 = vsel %vm414_vm2, %v411_v26, %v409_v14 }
  0x8d   : > { %v442_v32 = vmul.f32 %v1634_v22, %v433_v31  ;;  %v443_v33 = vmul.f32 %v1638_v23, %v432_v30  ;;  %v425_v48 = vmul.f32 %v1643_v24, %v416_v37  ;;  %v426_v49 = vmul.f32 %v1647_v25, %v415_v36 }
  0x8e   : > { %v1724_v27 = vrot.slane %v1602_v11, %v1711_v5 }
  0x8f   : > { %v548_v39 = vrot.slane %v442_v32, 4  ;;  %v549_v40 = vrot.slane %v443_v33, 4  ;;  %v447_v41 = vpop.permute.xlu1 %446  ;;  %v445_v42 = vpop.permute.xlu0 %444 }
  0x90   : > { %v449_v46 = vsel %vm448_vm3, %v445_v42, %v447_v41  ;;  %v450_v47 = vsel %vm448_vm3, %v447_v41, %v445_v42 }
  0x91   : > { %v459_v50 = vmul.f32 %v1660_v34, %v450_v47  ;;  %v460_v51 = vmul.f32 %v1664_v35, %v449_v46  ;;  %v572_v56 = vsel %vm570_vm4, %v426_v49, %v549_v40  ;;  %v571_v58 = vsel %vm570_vm4, %v425_v48, %v548_v39  ;;  %v1751_v49 = vld [vmem:[%s2001_s8 + $0x10] ss:$0 sm:$0xff] }
  0x93   : > { %v481_v54 = vpop.permute.xlu1 %480  ;;  %v479_v55 = vpop.permute.xlu0 %478  ;;  %v574_v57 = vsel %vm570_vm4, %v460_v51, %v555_v45  ;;  %v573_v59 = vsel %vm570_vm4, %v459_v50, %v554_v44 }
  0x94   : > { %v483_v60 = vsel %vm482_vm5, %v479_v55, %v481_v54  ;;  %v484_v61 = vsel %vm482_vm5, %v481_v54, %v479_v55  ;;  %v1312_v62 = vpack.c.bf16 %v574_v57, %v572_v56  ;;  %v1314_v63 = vpack.c.bf16 %v573_v59, %v571_v58  ;;  %v839_v55 = vld [vmem:[%s2000_s7 + $0x88] sm:$0xff]  ;;  %v822_v56 = vld [vmem:[%s2000_s7] sm:$0xff]  ;;  %v840_v59 = vld [vmem:[%s2000_s7 + $0x90] sm:$0xff] }
  0x95   : > { %v493_v8 = vmul.f32 %v1687_v52, %v483_v60  ;;  %v494_v9 = vmul.f32 %v1691_v53, %v484_v61  ;;  %v823_v57 = vld [vmem:[%s2000_s7 + $0x8] sm:$0xff]  ;;  %v841_v60 = vld [vmem:[%s2000_s7 + $0x98] sm:$0xff] }
  0x96   : > { %1313 = vmatprep.subr.bf16.mxu0 %v1312_v62  ;;  %v579_v62 = vld [vmem:[%s1994_s1] sm:$0xff] }
  0x97   : > { %v515_v14 = vpop.permute.xlu1 %514  ;;  %1315 = vmatpush1.bf16.msra.mxu0 %v1314_v63  ;;  %v513_v15 = vpop.permute.xlu0 %512  ;;  %v560_v29 = vrot.slane %v493_v8, 4  ;;  %v561_v30 = vrot.slane %v494_v9, 4  ;;  %v1338_v63 = vpack.c.bf16 %v823_v57, %v822_v56  ;;  %v1340_v8 = vpack.c.bf16 %v841_v60, %v840_v59  ;;  %v824_v9 = vld [vmem:[%s2000_s7 + $0x10] sm:$0xff]  ;;  %v834_v56 = vld [vmem:[%s2000_s7 + $0x60] sm:$0xff]  ;;  %v835_v57 = vld [vmem:[%s2000_s7 + $0x68] sm:$0xff] }
  0x98   : > { %v517_v20 = vsel %vm516_vm6, %v513_v15, %v515_v14  ;;  %v518_v21 = vsel %vm516_vm6, %v515_v14, %v513_v15  ;;  %v825_v14 = vld [vmem:[%s2000_s7 + $0x18] sm:$0xff]  ;;  %v842_v15 = vld [vmem:[%s2000_s7 + $0xa0] sm:$0xff]  ;;  %v852_v59 = vld [vmem:[%s2000_s7 + $0xf0] sm:$0xff] }
  0x99   : > { %v527_v26 = vmul.f32 %v1704_v3, %v517_v20  ;;  %v528_v6 = vmul.f32 %v1708_v4, %v518_v21  ;;  %v576_v42 = vsel %vm570_vm4, %v1557_v1, %v561_v30  ;;  %v575_v46 = vsel %vm570_vm4, %v1549_v0, %v560_v29  ;;  %v838_v0 = vld [vmem:[%s2000_s7 + $0x80] sm:$0xff]  ;;  %v843_v20 = vld [vmem:[%s2000_s7 + $0xa8] sm:$0xff]  ;;  %v844_v30 = vld [vmem:[%s2000_s7 + $0xb0] sm:$0xff] }
  0x9a   : > { %v1336_v61 = vpack.c.bf16 %v839_v55, %v838_v0  ;;  %v1342_v21 = vpack.c.bf16 %v825_v14, %v824_v9  ;;  %v827_v29 = vld [vmem:[%s2000_s7 + $0x28] sm:$0xff]  ;;  %v853_v60 = vld [vmem:[%s2000_s7 + $0xf8] sm:$0xff] }
  0x9b   : > { %v498_v31 = vpop.permute.xlu1 %497  ;;  %v496_v32 = vpop.permute.xlu0 %495  ;;  %v566_v37 = vrot.slane %v527_v26, 4  ;;  %v567_v39 = vrot.slane %v528_v6, 4  ;;  %v1344_v26 = vpack.c.bf16 %v843_v20, %v842_v15  ;;  %v826_v6 = vld [vmem:[%s2000_s7 + $0x20] sm:$0xff] }
  0x9c   : > { %v500_v33 = vsel %vm499_vm7, %v496_v32, %v498_v31  ;;  %v501_v36 = vsel %vm499_vm7, %v498_v31, %v496_v32  ;;  %v845_v31 = vld [vmem:[%s2000_s7 + $0xb8] sm:$0xff]  ;;  %v1346_v32 = vpack.c.bf16 %v827_v29, %v826_v6  ;;  %v403_v29 = vld [vmem:[%s2002_s9] sm:$0xff] }
  0x9d   : > { %v510_v11 = vmul.f32 %v1724_v27, %v500_v33  ;;  %v511_v40 = vmul.f32 %v1728_v28, %v501_v36  ;;  %v1348_v33 = vpack.c.bf16 %v845_v31, %v844_v30  ;;  %v828_v36 = vld [vmem:[%s2000_s7 + $0x30] sm:$0xff]  ;;  %v943_v30 = vrot.slane %v403_v29, %v1610_v13 }
  0x9e   : > { %v961_v31 = vrot.slane %v403_v29, %v1597_v10 }
  0x9f   : > { %v532_v41 = vpop.permute.xlu1 %531  ;;  %v578_v44 = vsel %vm570_vm4, %v511_v40, %v567_v39  ;;  %v530_v45 = vpop.permute.xlu0 %529  ;;  %v577_v47 = vsel %vm570_vm4, %v510_v11, %v566_v37  ;;  %v829_v37 = vld [vmem:[%s2000_s7 + $0x38] sm:$0xff]  ;;  %v846_v39 = vld [vmem:[%s2000_s7 + $0xc0] sm:$0xff]  ;;  %v847_v11 = vld [vmem:[%s2000_s7 + $0xc8] sm:$0xff]  ;;  %945 = vrot.lane.b32.xlu0 %v943_v30, %s1456_s12  ;;  %s1464_s12 = smov 126  }
  0xa0   : > { %v1316_v48 = vpack.c.bf16 %v578_v44, %v576_v42  ;;  %v534_v50 = vsel %vm533_vm8, %v530_v45, %v532_v41  ;;  %v535_v1 = vsel %vm533_vm8, %v532_v41, %v530_v45  ;;  %v1318_v51 = vpack.c.bf16 %v577_v47, %v575_v46  ;;  %v830_v42 = vld [vmem:[%s2000_s7 + $0x40] sm:$0xff]  ;;  %v831_v44 = vld [vmem:[%s2000_s7 + $0x48] sm:$0xff]  ;;  %v848_v45 = vld [vmem:[%s2000_s7 + $0xd0] sm:$0xff] }
  0xa1   : > { %v545_v54 = vmul.f32 %v1740_v12, %v535_v1  ;;  %v544_v58 = vmul.f32 %v1751_v49, %v534_v50  ;;  %v1350_v40 = vpack.c.bf16 %v829_v37, %v828_v36  ;;  %v1352_v41 = vpack.c.bf16 %v847_v11, %v846_v39  ;;  %v849_v46 = vld [vmem:[%s2000_s7 + $0xd8] sm:$0xff]  ;;  %v832_v50 = vld [vmem:[%s2000_s7 + $0x50] sm:$0xff]  ;;  %v1028_v30 = vld [vmem:[%s1999_s6] sm:$0xf] }
  0xa2   : > { %1317 = vmatprep.subr.bf16.mxu0 %v1316_v48  ;;  %v1354_v47 = vpack.c.bf16 %v831_v44, %v830_v42  ;;  %v1356_v48 = vpack.c.bf16 %v849_v46, %v848_v45  ;;  %v833_v1 = vld [vmem:[%s2000_s7 + $0x58] sm:$0xff]  ;;  %v970_v11 = vrot.slane %v403_v29, %v1671_v38 }
  0xa3   : > { %1319 = vmatpush1.bf16.msra.mxu0 %v1318_v51  ;;  %v850_v51 = vld [vmem:[%s2000_s7 + $0xe0] sm:$0xff]  ;;  %v1358_v0 = vpack.c.bf16 %v833_v1, %v832_v50  ;;  %963 = vrot.lane.b32.xlu0 %v961_v31, %s1457_s13  ;;  %s1465_s13 = smov 120  }
  0xa4   : > { %1236 = vmatprep.subr.msk.mxu0 %vm570_vm4, %v545_v54  ;;  %v851_v54 = vld [vmem:[%s2000_s7 + $0xe8] sm:$0xff] }
  0xa5   : > { %v1360_v55 = vpack.c.bf16 %v851_v54, %v850_v51 }
  0xa7   : > { %1237 = vmatpush1.msk.msra.mxu0 %vm570_vm4, %v544_v58  ;;  %v1362_v58 = vpack.c.bf16 %v835_v57, %v834_v56 }
  0xa8   : > { %1238 = vmatmul.mubr.msk.f32.vlgmr.msra.gmra.mrb[0].mxu0 %vm586_vm9, %v579_v62  ;;  %1337 = vmatprep.subr.bf16.mxu0 %v1336_v61  ;;  %v1364_v61 = vpack.c.bf16 %v853_v60, %v852_v59  ;;  %v836_v62 = vld [vmem:[%s2000_s7 + $0x70] sm:$0xff] }
  0xa9   : > { %1339 = vmatpush3.bf16.msra.mxu0 %v1338_v63  ;;  %v837_v63 = vld [vmem:[%s2000_s7 + $0x78] sm:$0xff] }
  0xaa   : > { %1341 = vmatprep.subr.bf16.mxu0 %v1340_v8  ;;  %v1366_v8 = vpack.c.bf16 %v837_v63, %v836_v62 }
  0xad   : > { %1343 = vmatpush3.bf16.msra.mxu0 %v1342_v21 }
  0xae   : > { %1345 = vmatprep.subr.bf16.mxu0 %v1344_v26 }
  0xb0   : > { %v584_v9 = vpop.permute.xlu0 %583 }
  0xb1   : > { %1347 = vmatpush3.bf16.msra.mxu0 %v1346_v32  ;;  %v979_v32 = vrot.slane %v403_v29, %v1711_v5  ;;  %v952_v5 = vrot.slane %v403_v29, %v1626_v19 }
  0xb2   : > { %1349 = vmatprep.subr.bf16.mxu0 %v1348_v33  ;;  %v1240_v33 = vld [vmem:[%s2002_s9 + $0x8] ss:$0 sm:$0xff] }
  0xb3   : > { %981 = vrot.lane.b32.xlu0 %v979_v32, %s1458_s14  ;;  %s1466_s14 = smov 54   ;;  %v734_v32 = vld [vmem:[%s1997_s4] sm:$0xf] }
  0xb5   : > { %1351 = vmatpush3.bf16.msra.mxu0 %v1350_v40  ;;  %v988_v40 = vrot.slane %v403_v29, %v1675_v43 }
  0xb6   : > { %1353 = vmatprep.subr.bf16.mxu0 %v1352_v41  ;;  %v934_v41 = vrot.slane %v403_v29, %v1614_v16 }
  0xb7   : > { %999 = vrot.lane.b32.xlu0 %v1240_v33, %s1459_s20  ;;  %s1469_s20 = smov 46  }
  0xb9   : > { %1355 = vmatpush3.bf16.msra.mxu0 %v1354_v47 }
  0xba   : > { %1357 = vmatprep.subr.bf16.mxu0 %v1356_v48 }
  0xbd   : > { %1359 = vmatpush3.bf16.msra.mxu0 %v1358_v0 }
  0xbe   : > { %1361 = vmatprep.subr.bf16.mxu0 %v1360_v55 }
  0xc1   : > { %1363 = vmatpush3.bf16.msra.mxu0 %v1362_v58 }
  0xc2   : > { %1365 = vmatprep.subr.bf16.mxu0 %v1364_v61 }
  0xc5   : > { %1367 = vmatpush3.bf16.msra.mxu0 %v1366_v8 }
 0x111   : > { %v946_v42 = vpop.permute.xlu0 %945 }
 0x115   : > { %v964_v46 = vpop.permute.xlu0 %963 }
 0x125   : > { %v982_v43 = vpop.permute.xlu0 %981 }
 0x129   : > { %v1000_v0 = vpop.permute.xlu0 %999 }
 0x17b   : > { %v662_v14 = vpop.f32.mrb[0].mxu0 }
 0x17c   : > { %v663_v15 = vadd.f32 %v662_v14, %v584_v9  ;;  %v664_v20 = vpop.f32.mrb[1].mxu0 }
 0x17d   : > { %v665_v21 = vadd.f32 %v664_v20, %v584_v9 }
 0x17e   : > { %v1862_v6 = vmax.f32 %v663_v15, 0.0 }
 0x17f   : > { %v1860_v26 = vmax.f32 %v665_v21, 0.0 }
 0x181   : > { %918 = vmatprep.mubr.f32.mxu0 %v1860_v26 }
 0x182   : > { %919 = vmatmul.mubr.f32.vlgmr.msra.gmra.mrb[2].mxu0 %v1862_v6 }
 0x255   : > { %v1278_v36 = vpop.f32.mrb[2].mxu0 }
 0x256   : > { %v1279_v37 = vpop.f32.mrb[3].mxu0 }
 0x257   : > { %v1280_v39 = vadd.f32 %v1279_v37, %v1278_v36 }
 0x259   : > { %925 = vrot.lane.b32.xlu1 %v1280_v39, %s1460_s21 }
 0x2cb   : > { %v926_v13 = vpop.permute.xlu1 %925 }
 0x2cc   : > { %v927_v10 = vsel %vm924_vm10, %v926_v13, %v1280_v39 }
 0x2cd   : > { %928 = vrot.lane.b32.xlu1 %v927_v10, %s1460_s21 }
 0x2d1   : > { %954 = vrot.lane.b32.xlu1 %v952_v5, %s1461_s22 }
 0x2d5   : > { %972 = vrot.lane.b32.xlu1 %v970_v11, %s1446_s23 }
 0x2d9   : > { %990 = vrot.lane.b32.xlu1 %v988_v40, %s1462_s19 }
 0x2dd   : > { %936 = vrot.lane.b32.xlu1 %v934_v41, %s1463_s30 }
 0x33f   : > { %v929_v44 = vpop.permute.xlu1 %928 }
 0x340   : > { %v930_v45 = vsel %vm924_vm10, %v929_v44, %v1280_v39 }
 0x341   : > { %v948_v19 = vmul.f32 %v946_v42, %v930_v45  ;;  %v966_v48 = vmul.f32 %v964_v46, %v930_v45  ;;  %v984_v54 = vmul.f32 %v982_v43, %v930_v45  ;;  %v1002_v55 = vmul.f32 %v1000_v0, %v930_v45 }
 0x343   : > { %v955_v47 = vpop.permute.xlu1 %954  ;;  %1004 = vrot.lane.b32.xlu0 %v948_v19, %s1450_s27 }
 0x344   : > { %v957_v38 = vmul.f32 %v955_v47, %v930_v45 }
 0x346   : > { %1007 = vrot.lane.b32.xlu1 %v957_v38, %s1464_s12 }
 0x347   : > { %v973_v50 = vpop.permute.xlu1 %972  ;;  %1010 = vrot.lane.b32.xlu0 %v966_v48, %s1465_s13 }
 0x348   : > { %v975_v16 = vmul.f32 %v973_v50, %v930_v45 }
 0x34a   : > { %1013 = vrot.lane.b32.xlu1 %v1280_v39, %s1463_s30  ;;  %s2009_s30 = sshll.u32 %s2011_s18, 3 }
 0x34b   : > { %v991_v1 = vpop.permute.xlu1 %990  ;;  %1016 = vrot.lane.b32.xlu0 %v975_v16, %s1466_s14  ;;  %s393_s14 = scalar_lea.vmem %s2003_s10, %s2009_s30 }
 0x34c   : > { %v993_v51 = vmul.f32 %v991_v1, %v930_v45 }
 0x34e   : > { %1019 = vrot.lane.b32.xlu1 %v984_v54, %s1467_s15  ;;  %s1233_s15 = sshll.u32 %s2011_s18, 2 }
 0x34f   : > { %1022 = vrot.lane.b32.xlu0 %v993_v51, %s1468_s16  ;;  %v937_v56 = vpop.permute.xlu1 %936 }
 0x350   : > { %v939_v57 = vmul.f32 %v937_v56, %v930_v45 }
 0x352   : > { %1025 = vrot.lane.b32.xlu1 %v1002_v55, %s1469_s20 }
 0x353   : > { %669 = vrot.lane.b32.xlu0 %v1862_v6, %s1448_s25 }
 0x356   : > { %671 = vrot.lane.b32.xlu1 %v1860_v26, %s1448_s25 }
 0x357   : > { %677 = vrot.lane.b32.xlu0 %v1862_v6, %s1447_s24 }
 0x35a   : > { %679 = vrot.lane.b32.xlu1 %v1860_v26, %s1447_s24  ;;  %s2008_s24 = smov 111  }
 0x35b   : > { %685 = vrot.lane.b32.xlu0 %v1862_v6, %s1449_s26 }
 0x35e   : > { %687 = vrot.lane.b32.xlu1 %v1860_v26, %s1449_s26 }
 0x35f   : > { %693 = vrot.lane.b32.xlu0 %v1862_v6, %s1446_s23 }
 0x362   : > { %695 = vrot.lane.b32.xlu1 %v1860_v26, %s1446_s23  ;;  %s1470_s23 = smov 73  }
 0x363   : > { %701 = vrot.lane.b32.xlu0 %v1862_v6, %s1450_s27 }
 0x366   : > { %703 = vrot.lane.b32.xlu1 %v1860_v26, %s1450_s27 }
 0x367   : > { %709 = vrot.lane.b32.xlu0 %v1862_v6, %s1453_s29 }
 0x36a   : > { %711 = vrot.lane.b32.xlu1 %v1860_v26, %s1453_s29 }
 0x36b   : > { %717 = vrot.lane.b32.xlu0 %v1862_v6, %s1451_s28 }
 0x36e   : > { %719 = vrot.lane.b32.xlu1 %v1860_v26, %s1451_s28 }
 0x36f   : > { %725 = vrot.lane.b32.xlu0 %v1862_v6, %s2008_s24 }
 0x372   : > { %727 = vrot.lane.b32.xlu1 %v1860_v26, %s2008_s24  ;;  %s397_s24 = scalar_lea.vmem %s2004_s11, %s1233_s15 }
 0x3b5   : > { %v1005_v58 = vpop.permute.xlu0 %1004 }
 0x3b6   : > { %v1416_v59 = vpack.i.bf16 %v1005_v58, %v939_v57 }
 0x3b8   : > { %v1008_v60 = vpop.permute.xlu1 %1007  ;;  %1417 = vrot.lane.b32.xlu0 %v1416_v59, %s1470_s23 }
 0x3b9   : > { %v1011_v61 = vpop.permute.xlu0 %1010 }
 0x3ba   : > { %v1421_v62 = vpack.i.bf16 %v1011_v61, %v1008_v60 }
 0x3bc   : > { %v1014_v63 = vpop.permute.xlu1 %1013  ;;  %1422 = vrot.lane.b32.xlu1 %v1421_v62, %s1470_s23 }
 0x3bd   : > { %v1017_v8 = vpop.permute.xlu0 %1016 }
 0x3be   : > { %v1426_v9 = vpack.i.bf16 %v1017_v8, %v1014_v63 }
 0x3c0   : > { %v1020_v14 = vpop.permute.xlu1 %1019  ;;  %1427 = vrot.lane.b32.xlu0 %v1426_v9, %s1470_s23 }
 0x3c1   : > { %v1023_v15 = vpop.permute.xlu0 %1022 }
 0x3c2   : > { %v1431_v20 = vpack.i.bf16 %v1023_v15, %v1020_v14 }
 0x3c4   : > { %v1026_v21 = vpop.permute.xlu1 %1025  ;;  %1432 = vrot.lane.b32.xlu1 %v1431_v20, %s1470_s23 }
 0x3c5   : > { %1051 = vrot.lane.b32.xlu0 %v1026_v21, %s1470_s23  ;;  %v670_v29 = vpop.permute.xlu0 %669 }
 0x3c8   : > { %v672_v31 = vpop.permute.xlu1 %671  ;;  %737 = vperm.xlu1 %1436, %v734_v32  }
 0x3c9   : > { %1031 = vperm.xlu0 %1415, %v1028_v30   ;;  %v678_v33 = vpop.permute.xlu0 %677  ;;  %v673_v36 = vsel %vm414_vm2, %v670_v29, %v672_v31  ;;  %v674_v37 = vsel %vm414_vm2, %v672_v31, %v670_v29 }
 0x3ca   : > { %v675_v11 = vmul.f32 %v674_v37, %v1643_v24  ;;  %v676_v41 = vmul.f32 %v673_v36, %v1647_v25 }
 0x3cc   : > { %v680_v39 = vpop.permute.xlu1 %679 }
 0x3cd   : > { %v681_v13 = vsel %vm431_vm1, %v678_v33, %v680_v39  ;;  %v682_v10 = vsel %vm431_vm1, %v680_v39, %v678_v33  ;;  %v686_v5 = vpop.permute.xlu0 %685 }
 0x3ce   : > { %v683_v40 = vmul.f32 %v682_v10, %v1634_v22  ;;  %v684_v42 = vmul.f32 %v681_v13, %v1638_v23 }
 0x3d0   : > { %v688_v44 = vpop.permute.xlu1 %687  ;;  %v1320_v45 = vpack.c.bf16 %v684_v42, %v676_v41  ;;  %v1322_v46 = vpack.c.bf16 %v683_v40, %v675_v11  ;;  %v1027_v41 = vld [vmem:[%s1998_s5] sm:$0xf] }
 0x3d1   : > { %v694_v19 = vpop.permute.xlu0 %693  ;;  %v689_v47 = vsel %vm448_vm3, %v686_v5, %v688_v44  ;;  %v690_v38 = vsel %vm448_vm3, %v688_v44, %v686_v5 }
 0x3d2   : > { %1321 = vmatprep.subr.bf16.mxu1 %v1320_v45  ;;  %v691_v25 = vmul.f32 %v690_v38, %v1660_v34  ;;  %v692_v43 = vmul.f32 %v689_v47, %v1664_v35 }
 0x3d3   : > { %1323 = vmatpush1.bf16.msra.mxu1 %v1322_v46 }
 0x3d4   : > { %v696_v48 = vpop.permute.xlu1 %695 }
 0x3d5   : > { %v697_v22 = vsel %vm465_vm0, %v694_v19, %v696_v48  ;;  %v698_v24 = vsel %vm465_vm0, %v696_v48, %v694_v19  ;;  %v702_v23 = vpop.permute.xlu0 %701 }
 0x3d6   : > { %v699_v50 = vmul.f32 %v698_v24, %v1618_v17  ;;  %v700_v16 = vmul.f32 %v697_v22, %v1622_v18 }
 0x3d8   : > { %v704_v1 = vpop.permute.xlu1 %703  ;;  %v1324_v51 = vpack.c.bf16 %v700_v16, %v692_v43  ;;  %v1326_v54 = vpack.c.bf16 %v699_v50, %v691_v25 }
 0x3d9   : > { %v705_v0 = vsel %vm482_vm5, %v702_v23, %v704_v1  ;;  %v706_v55 = vsel %vm482_vm5, %v704_v1, %v702_v23  ;;  %v710_v56 = vpop.permute.xlu0 %709 }
 0x3da   : > { %v707_v57 = vmul.f32 %v705_v0, %v1687_v52  ;;  %v708_v34 = vmul.f32 %v706_v55, %v1691_v53  ;;  %1325 = vmatprep.subr.bf16.mxu1 %v1324_v51 }
 0x3db   : > { %1327 = vmatpush1.bf16.msra.mxu1 %v1326_v54 }
 0x3dc   : > { %v712_v35 = vpop.permute.xlu1 %711  ;;  %v1328_v17 = vpack.c.bf16 %v708_v34, %v1860_v26  ;;  %v1330_v18 = vpack.c.bf16 %v707_v57, %v1862_v6 }
 0x3dd   : > { %v718_v58 = vpop.permute.xlu0 %717  ;;  %v713_v59 = vsel %vm499_vm7, %v710_v56, %v712_v35  ;;  %v714_v60 = vsel %vm499_vm7, %v712_v35, %v710_v56 }
 0x3de   : > { %1329 = vmatprep.subr.bf16.mxu1 %v1328_v17  ;;  %v715_v26 = vmul.f32 %v713_v59, %v1724_v27  ;;  %v716_v6 = vmul.f32 %v714_v60, %v1728_v28 }
 0x3df   : > { %1331 = vmatpush1.bf16.msra.mxu1 %v1330_v18 }
 0x3e0   : > { %v720_v61 = vpop.permute.xlu1 %719 }
 0x3e1   : > { %v721_v52 = vsel %vm516_vm6, %v718_v58, %v720_v61  ;;  %v722_v53 = vsel %vm516_vm6, %v720_v61, %v718_v58  ;;  %v726_v8 = vpop.permute.xlu0 %725 }
 0x3e2   : > { %v723_v62 = vmul.f32 %v721_v52, %v1704_v3  ;;  %v724_v63 = vmul.f32 %v722_v53, %v1708_v4  ;;  %v733_v3 = vld [vmem:[%s1996_s3] sm:$0xf]  ;;  %v1471_v4 = vmov 0.0|0.0  }
 0x3e4   : > { %v728_v9 = vpop.permute.xlu1 %727  ;;  %v1332_v14 = vpack.c.bf16 %v724_v63, %v716_v6  ;;  %v1334_v15 = vpack.c.bf16 %v723_v62, %v715_v26 }
 0x3e5   : > { %v730_v20 = vsel %vm533_vm8, %v728_v9, %v726_v8  ;;  %v729_v21 = vsel %vm533_vm8, %v726_v8, %v728_v9 }
 0x3e6   : > { %v732_v29 = vmul.f32 %v1740_v12, %v730_v20  ;;  %1333 = vmatprep.subr.bf16.mxu1 %v1332_v14  ;;  %v731_v27 = vmul.f32 %v1751_v49, %v729_v21 }
 0x3e7   : > { %1335 = vmatpush1.bf16.msra.mxu1 %v1334_v15 }
 0x3e8   : > { %760 = vmatprep.subr.mxu1 %v732_v29 }
 0x3eb   : > { %761 = vmatpush1.msra.mxu1 %v731_v27 }
 0x3ec   : > { %1239 = vmatmul.mubr.msk.f32.vlgmr.msra.gmra.mrb[0].mxu1 %vm740_vm11, %v733_v3  ;;  %1368 = vmatprep.subr.bf16.mxu1 %v1471_v4 }
 0x3ed   : > { %1309 = vmatprep.mubr.msk.f32.mxu1 %vm1472_vm12, %v1452_v2 }
 0x42a   : > { %v1418_v7 = vpop.permute.xlu0 %1417 }
 0x42b   : > { %v1420_v28 = vunpack.i.h.bf16 %v1418_v7  ;;  %v1419_v12 = vunpack.i.l.bf16 %v1418_v7 }
 0x42d   : > { %v1369_v30 = vpack.c.bf16 %v1420_v28, %v1419_v12 }
 0x42e   : > { %v1423_v31 = vpop.permute.xlu1 %1422 }
 0x42f   : > { %v1425_v32 = vunpack.i.h.bf16 %v1423_v31  ;;  %v1424_v49 = vunpack.i.l.bf16 %v1423_v31  ;;  %1370 = vmatpush3.bf16.msra.mxu1 %v1369_v30 }
 0x430   : > { %1371 = vmatprep.subr.bf16.mxu1 %v1471_v4 }
 0x431   : > { %v1372_v33 = vpack.c.bf16 %v1425_v32, %v1424_v49 }
 0x432   : > { %v1428_v36 = vpop.permute.xlu0 %1427 }
 0x433   : > { %v1430_v37 = vunpack.i.h.bf16 %v1428_v36  ;;  %v1429_v39 = vunpack.i.l.bf16 %v1428_v36  ;;  %1373 = vmatpush3.bf16.msra.mxu1 %v1372_v33 }
 0x434   : > { %1374 = vmatprep.subr.bf16.mxu1 %v1471_v4 }
 0x435   : > { %v1375_v13 = vpack.c.bf16 %v1430_v37, %v1429_v39 }
 0x436   : > { %v1433_v10 = vpop.permute.xlu1 %1432 }
 0x437   : > { %v1435_v5 = vunpack.i.h.bf16 %v1433_v10  ;;  %v1434_v11 = vunpack.i.l.bf16 %v1433_v10  ;;  %1376 = vmatpush3.bf16.msra.mxu1 %v1375_v13  ;;  %v1052_v42 = vpop.permute.xlu0 %1051 }
 0x438   : > { %1377 = vmatprep.subr.bf16.mxu1 %v1471_v4 }
 0x439   : > { %v1378_v40 = vpack.c.bf16 %v1435_v5, %v1434_v11 }
 0x43b   : > { %1379 = vmatpush3.bf16.msra.mxu1 %v1378_v40 }
 0x43c   : > { %1307 = vmatprep.subr.mxu1 %v1452_v2 }
 0x43f   : > { %1308 = vmatpush3.msra.mxu1 %v1052_v42 }
 0x440   : > { %1310 = vmatmul.mubr.msk.f32.vlgmr.msra.gmra.mrb[2].mxu1 %vm740_vm11, %v1027_v41 }
 0x447   : > { %v738_v44 = vpop.permute.xlu1 %737 }
 0x448   : > { %v1032_v22 = vpop.permute.xlu0 %1031 }
 0x4bf   : > { %v810_v45 = vpop.f32.mrb[0].mxu1 }
 0x4c0   : > { %v811_v46 = vadd.f32 %v810_v45, %v738_v44  ;;  %v812_v19 = vpop.f32.mrb[1].mxu1 }
 0x4c1   : > { %v813_v47 = vadd.f32 %v812_v19, %v738_v44 }
 0x4c2   : > { %v815_v38 = vmax.f32 %v811_v46, 0.0 }
 0x4c3   : > { %v816_v48 = vmax.f32 %v813_v47, 0.0 }
 0x4c5   : > { %v819_v2 = vcombine.low %v815_v38, %v816_v48 }
 0x4c7   : > { %821 = vst [vmem:[%s393_s14] sm:$0xff] %v819_v2 }
 0x513   : > { %v1131_v24 = vpop.f32.mrb[2].mxu1 }
 0x514   : > { %v1132_v23 = vadd.f32 %v1131_v24, %v1032_v22  ;;  %v1311_v25 = vpop.f32.mrb[3].mxu1 }
 0x516   : > { %v1135_v43 = vmax.f32 %v1132_v23, 0.0 }
 0x518   : > { %1137 = vst.msk [vmem:[%s397_s24] sm:$0xf] %vm1136_vm13, %v1135_v43 }
 0x519 PF: > { %s22_s17 = sadd.s32 1, %s1444_s17  }
 0x51a   : > { %p19_p4 = scmp.ge.s32.totalorder %s22_s17, 4  }
 0x51c   :  { %21 = sbr.rel (!%p19_p4) target bundleno = 1 (0x1), region = 102 }

</bundles_post_ra>
